<compile_context>
chip_gen: v7x
topology: tpu7x:2x2x1
jax: 0.10.0
libtpu: 0.0.40
codegen_flags: <defaults>
</compile_context>

<pallas_src>
import functools

import jax
import jax.numpy as jnp
from jax import lax
from jax.experimental import pallas as pl
from jax.experimental.pallas import tpu as pltpu


def _round_up(x, m):
    return (x + m - 1) // m * m


def _rnn_kernel(x_ref, wih_ref, whh_ref, b_ref, wfc_ref, bfc_ref,
                out_ref, xproj_ref, *, n_chains, step_unroll):
    """One batch tile: x_ref (T, Bt, E) -> out_ref (Bt, Op)."""
    T, Bt, E = x_ref.shape
    Hp = whh_ref.shape[1]
    Tc = xproj_ref.shape[0] // Bt          # time-chunk length (static)
    sub = Bt // n_chains                   # rows per independent chain

    wih = wih_ref[...]                     # (E, Hp)   resident
    whh = whh_ref[...]                     # (Hp, Hp)  resident
    bias = b_ref[...]                      # (1, Hp)   f32, b_ih + b_hh folded

    def project(t_start, tc):
        # Recurrence-independent projection for `tc` steps: ONE MXU matmul with
        # M = tc*Bt rows, bias folded in once; result kept in f32 VMEM scratch.
        x_chunk = x_ref[pl.ds(t_start, tc)]                      # (tc, Bt, E)
        xproj_ref[0:tc * Bt, :] = (
            jnp.dot(x_chunk.reshape(tc * Bt, E), wih,
                    preferred_element_type=jnp.float32) + bias)

    def run_steps(tc, hs):
        # Serial recurrence over `tc` steps; `hs` holds n_chains independent
        # f32 (sub, Hp) hidden states so MXU / EUP work overlaps across chains.
        def step(t, hs):
            new = []
            for c in range(n_chains):
                r0 = pl.multiple_of(t * Bt + c * sub, sub)
                pre = xproj_ref[pl.ds(r0, sub), :] + jnp.dot(
                    hs[c].astype(whh.dtype), whh,
                    preferred_element_type=jnp.float32)
                new.append(jnp.tanh(pre))
            return tuple(new)
        return lax.fori_loop(0, tc, step, hs, unroll=min(step_unroll, tc))

    hs = tuple(jnp.zeros((sub, Hp), jnp.float32) for _ in range(n_chains))

    n_full = T // Tc
    rem = T - n_full * Tc

    def chunk_body(c, hs):
        project(pl.multiple_of(c * Tc, Tc), Tc)
        return run_steps(Tc, hs)

    if n_full > 0:
        hs = lax.fori_loop(0, n_full, chunk_body, hs)
    if rem > 0:
        project(n_full * Tc, rem)
        hs = run_steps(rem, hs)

    # Fused final FC; Op is a multiple of 128 -> lane-dense stores.
    wfc = wfc_ref[...]
    bfc = bfc_ref[...]
    for c in range(n_chains):
        out_ref[c * sub:(c + 1) * sub, :] = (
            jnp.dot(hs[c].astype(wfc.dtype), wfc,
                    preferred_element_type=jnp.float32) + bfc)


def rnn_forward(text, params, *, compute_dtype=jnp.bfloat16, b_tile=None,
                t_chunk=16, n_chains=2, step_unroll=8):
    """text: int32 (B, T). Returns float32 (B, output_dim) == fc(h_T)."""
    emb = params["embedding"]                       # (V, E)
    wih, whh = params["wih"], params["whh"]         # PyTorch layouts (H, E), (H, H)
    bih, bhh = params["bih"], params["bhh"]         # (H,), (H,)
    wfc, bfc = params["wfc"], params["bfc"]         # (O, H), (O,)

    B, T = text.shape
    E = emb.shape[1]
    H = whh.shape[0]
    O = wfc.shape[0]

    itemsize = jnp.dtype(compute_dtype).itemsize
    pack = 8 * (4 // itemsize)                      # sublane pack: 8 f32, 16 bf16

    # Batch tile: fill the MXU M dimension (cap 256), sublane-pack aligned.
    if b_tile is None:
        b_tile = min(256, _round_up(B, pack))
    b_tile = _round_up(b_tile, pack)
    Bp = _round_up(B, b_tile)
    num_b_tiles = Bp // b_tile

    # Independent recurrence chains per tile; each chain stays pack-aligned.
    n_chains = max(1, min(n_chains, b_tile // pack))
    while n_chains > 1 and b_tile % (n_chains * pack) != 0:
        n_chains -= 1

    # Lane-aligned padded sizes. E is intentionally NOT padded: x is the only
    # large streamed operand and the MXU pads a small K internally, so padding
    # E in HBM would only inflate gather + DMA traffic.
    Hp = _round_up(H, 128)
    Op = _round_up(O, 128)

    Tc = min(t_chunk, T)                            # projection time-chunk

    # Embedding gather directly time-major and in the compute dtype (no f32 /
    # lane-padded round trip through HBM). padding_idx only affects gradients.
    x = jnp.take(emb.astype(compute_dtype), text.T, axis=0)        # (T, B, E)
    x = jnp.pad(x, ((0, 0), (0, Bp - B), (0, 0)))

    # Matmul-friendly (in, out) layouts, padded; RNN biases folded; biases f32.
    # Zero padding is semantics-preserving: padded hidden units stay exactly 0
    # through the tanh recurrence and the FC.
    wih_t = jnp.pad(wih.T, ((0, 0), (0, Hp - H))).astype(compute_dtype)   # (E, Hp)
    whh_t = jnp.pad(whh.T, ((0, Hp - H), (0, Hp - H))).astype(compute_dtype)
    b_rnn = jnp.pad(bih + bhh, (0, Hp - H)).reshape(1, Hp).astype(jnp.float32)
    wfc_t = jnp.pad(wfc.T, ((0, Hp - H), (0, Op - O))).astype(compute_dtype)
    bfc_p = jnp.pad(bfc, (0, Op - O)).reshape(1, Op).astype(jnp.float32)

    # VMEM budget: streamed x tile (double-buffered) + resident weights
    # (single-buffered) + out tile (double-buffered) + projection scratch,
    # plus ~25% headroom.
    x_block = T * b_tile * E * itemsize
    w_bytes = (E * Hp + Hp * Hp + Hp * Op) * itemsize + (Hp + Op) * 4
    out_block = b_tile * Op * 4
    xproj_bytes = Tc * b_tile * Hp * 4
    vmem_need = 2 * x_block + w_bytes + 2 * out_block + xproj_bytes
    vmem_limit = int(min(max(vmem_need * 5 // 4, 32 * 2**20), 64 * 2**20))

    resident = pl.Buffered(1)   # constant-index weights: no second pipeline buffer

    kernel = functools.partial(_rnn_kernel, n_chains=n_chains,
                               step_unroll=step_unroll)

    out_padded = pl.pallas_call(
        kernel,
        out_shape=jax.ShapeDtypeStruct((Bp, Op), jnp.float32),
        grid_spec=pltpu.PrefetchScalarGridSpec(
            num_scalar_prefetch=0,
            grid=(num_b_tiles,),
            in_specs=[
                pl.BlockSpec((T, b_tile, E), lambda i: (0, i, 0)),  # x batch tile
                pl.BlockSpec((E, Hp), lambda i: (0, 0),             # W_ih^T
                             pipeline_mode=resident),
                pl.BlockSpec((Hp, Hp), lambda i: (0, 0),            # W_hh^T
                             pipeline_mode=resident),
                pl.BlockSpec((1, Hp), lambda i: (0, 0),             # b_ih + b_hh
                             pipeline_mode=resident),
                pl.BlockSpec((Hp, Op), lambda i: (0, 0),            # W_fc^T
                             pipeline_mode=resident),
                pl.BlockSpec((1, Op), lambda i: (0, 0),             # b_fc
                             pipeline_mode=resident),
            ],
            out_specs=pl.BlockSpec((b_tile, Op), lambda i: (i, 0)),
            scratch_shapes=[pltpu.VMEM((Tc * b_tile, Hp), jnp.float32)],
        ),
        compiler_params=pltpu.CompilerParams(
            dimension_semantics=("parallel",),
            vmem_limit_bytes=vmem_limit),
    )(x, wih_t, whh_t, b_rnn, wfc_t, bfc_p)

    return out_padded[:B, :O]


def rnn_reference(text, params):
    """Pure-JAX reference matching the PyTorch module's forward."""
    x = jnp.take(params["embedding"], text, axis=0)      # (B, T, E)
    wih, whh = params["wih"], params["whh"]
    b = params["bih"] + params["bhh"]
    B = x.shape[0]
    H = whh.shape[0]

    def step(h, x_t):
        return jnp.tanh(x_t @ wih.T + h @ whh.T + b), None

    h_T, _ = lax.scan(step, jnp.zeros((B, H), jnp.float32),
                      jnp.transpose(x, (1, 0, 2)))
    return h_T @ params["wfc"].T + params["bfc"]


def init_params(key, vocab_size, embedding_dim, hidden_dim, output_dim):
    ks = jax.random.split(key, 7)
    s = 0.1
    E, H, O = embedding_dim, hidden_dim, output_dim
    return {
        "embedding": jax.random.normal(ks[0], (vocab_size, E), jnp.float32) * s,
        # PyTorch nn.RNN parameter layouts
        "wih": jax.random.normal(ks[1], (H, E), jnp.float32) * s,   # weight_ih_l0
        "whh": jax.random.normal(ks[2], (H, H), jnp.float32) * s,   # weight_hh_l0
        "bih": jax.random.normal(ks[3], (H,), jnp.float32) * s,     # bias_ih_l0
        "bhh": jax.random.normal(ks[4], (H,), jnp.float32) * s,     # bias_hh_l0
        # fc
        "wfc": jax.random.normal(ks[5], (O, H), jnp.float32) * s,
        "bfc": jax.random.normal(ks[6], (O,), jnp.float32) * s,
    }


if __name__ == "__main__":
    key = jax.random.PRNGKey(0)

    # Small config matching the module (batch=2, seq=8, emb=16, hidden=32, out=4).
    B, T, VOCAB, E, H, O = 2, 8, 50, 16, 32, 4
    pkey, tkey, key = jax.random.split(key, 3)
    params = init_params(pkey, VOCAB, E, H, O)
    text = jax.random.randint(tkey, (B, T), 0, VOCAB, dtype=jnp.int32)
    ref = rnn_reference(text, params)

    # f32 compute path: tight check against the pure-JAX reference.
    out_f32 = rnn_forward(text, params, compute_dtype=jnp.float32)
    jax.block_until_ready(out_f32)
    assert out_f32.shape == (B, O) and out_f32.dtype == jnp.float32
    assert jnp.allclose(out_f32, ref, atol=2e-2, rtol=2e-2), "f32 mismatch"

    # bf16 compute path (default, MXU-friendly): loose check.
    out_bf16 = rnn_forward(text, params)
    jax.block_until_ready(out_bf16)
    assert out_bf16.shape == (B, O) and out_bf16.dtype == jnp.float32
    assert jnp.allclose(out_bf16, ref, atol=5e-2, rtol=5e-2), "bf16 mismatch"

    # Slightly larger config exercising a 2-tile grid, 2 interleaved recurrence
    # chains per tile, and a multi-chunk projection with a remainder chunk.
    B2, T2, VOCAB2, E2, H2, O2 = 64, 20, 97, 24, 48, 6
    pkey2, tkey2, _ = jax.random.split(key, 3)
    params2 = init_params(pkey2, VOCAB2, E2, H2, O2)
    text2 = jax.random.randint(tkey2, (B2, T2), 0, VOCAB2, dtype=jnp.int32)
    ref2 = rnn_reference(text2, params2)

    out2 = rnn_forward(text2, params2, b_tile=32, t_chunk=8)
    jax.block_until_ready(out2)
    assert out2.shape == (B2, O2)
    assert jnp.allclose(out2, ref2, atol=5e-2, rtol=5e-2), "bf16 (large) mismatch"

    print("KERNEL_OK")
</pallas_src>

<mosaic_0001>
module attributes {stable_mosaic.version = 11 : i64} {
  func.func @_rnn_kernel(%arg0: i32, %arg1: memref<8x8x16xf32, #tpu.memory_space<vmem>>, %arg2: memref<16x128xf32, #tpu.memory_space<vmem>>, %arg3: memref<128x128xf32, #tpu.memory_space<vmem>>, %arg4: memref<1x128xf32, #tpu.memory_space<vmem>>, %arg5: memref<128x128xf32, #tpu.memory_space<vmem>>, %arg6: memref<1x128xf32, #tpu.memory_space<vmem>>, %arg7: memref<8x128xf32, #tpu.memory_space<vmem>>, %arg8: memref<64x128xf32, #tpu.memory_space<vmem>>) attributes {dimension_semantics = [#tpu.dimension_semantics<parallel>], iteration_bounds = array<i64: 1>, scalar_prefetch = 0 : i64, scratch_operands = 1 : i64, tpu.core_type = #tpu.core_type<tc>, window_params = [{transform_indices = @transform_0, window_bounds = array<i64: 8, 8, 16>}, {pipeline_mode = #tpu.pipeline_mode<synchronous>, transform_indices = @transform_1, window_bounds = array<i64: 16, 128>}, {pipeline_mode = #tpu.pipeline_mode<synchronous>, transform_indices = @transform_2, window_bounds = array<i64: 128, 128>}, {pipeline_mode = #tpu.pipeline_mode<synchronous>, transform_indices = @transform_3, window_bounds = array<i64: 1, 128>}, {pipeline_mode = #tpu.pipeline_mode<synchronous>, transform_indices = @transform_4, window_bounds = array<i64: 128, 128>}, {pipeline_mode = #tpu.pipeline_mode<synchronous>, transform_indices = @transform_5, window_bounds = array<i64: 1, 128>}, {transform_indices = @transform_6, window_bounds = array<i64: 8, 128>}]} {
    %c0 = arith.constant 0 : index
    %c0_0 = arith.constant 0 : index
    %0 = vector.load %arg2[%c0, %c0_0] : memref<16x128xf32, #tpu.memory_space<vmem>>, vector<16x128xf32>
    %c0_1 = arith.constant 0 : index
    %c0_2 = arith.constant 0 : index
    %1 = vector.load %arg3[%c0_1, %c0_2] : memref<128x128xf32, #tpu.memory_space<vmem>>, vector<128x128xf32>
    %c0_3 = arith.constant 0 : index
    %c0_4 = arith.constant 0 : index
    %2 = vector.load %arg4[%c0_3, %c0_4] : memref<1x128xf32, #tpu.memory_space<vmem>>, vector<1x128xf32>
    %cst = arith.constant 0.000000e+00 : f32
    %3 = vector.broadcast %cst : f32 to vector<8x128xf32>
    %c0_i32 = arith.constant 0 : i32
    %c8_i32 = arith.constant 8 : i32
    %4 = arith.muli %c0_i32, %c8_i32 : i32
    %5 = tpu.assume_multiple %4, 8 : i32
    %6 = arith.index_cast %5 : i32 to index
    %c0_5 = arith.constant 0 : index
    %c0_6 = arith.constant 0 : index
    %7 = vector.load %arg1[%6, %c0_5, %c0_6] : memref<8x8x16xf32, #tpu.memory_space<vmem>>, vector<8x8x16xf32>
    %8 = vector.shape_cast %7 : vector<8x8x16xf32> to vector<64x16xf32>
    %cst_7 = arith.constant dense<0.000000e+00> : vector<64x128xf32>
    %9 = tpu.matmul %8, %0, %cst_7 {dimension_numbers = #tpu.dot_dimension_numbers<[1], [0], [0], [1], [0, 0, 1, 1], [], []>} : vector<64x16xf32>, vector<16x128xf32>, vector<64x128xf32> -> vector<64x128xf32>
    %10 = vector.broadcast %2 : vector<1x128xf32> to vector<64x128xf32>
    %11 = arith.addf %9, %10 : vector<64x128xf32>
    %c0_8 = arith.constant 0 : index
    %c0_9 = arith.constant 0 : index
    %12 = vector.load %arg8[%c0_8, %c0_9] : memref<64x128xf32, #tpu.memory_space<vmem>>, vector<64x128xf32>
    tpu.vector_store %arg8[%c0_8, %c0_9], %11 {strides = array<i32>} : memref<64x128xf32, #tpu.memory_space<vmem>>, vector<64x128xf32>,
    %c0_i32_10 = arith.constant 0 : i32
    %c8_i32_11 = arith.constant 8 : i32
    %13 = arith.muli %c0_i32_10, %c8_i32_11 : i32
    %c0_i32_12 = arith.constant 0 : i32
    %14 = arith.addi %13, %c0_i32_12 : i32
    %15 = tpu.assume_multiple %14, 8 : i32
    %16 = arith.index_cast %15 : i32 to index
    %c0_13 = arith.constant 0 : index
    %17 = vector.load %arg8[%16, %c0_13] : memref<64x128xf32, #tpu.memory_space<vmem>>, vector<8x128xf32>
    %cst_14 = arith.constant dense<0.000000e+00> : vector<8x128xf32>
    %18 = tpu.matmul %3, %1, %cst_14 {dimension_numbers = #tpu.dot_dimension_numbers<[1], [0], [0], [1], [0, 0, 1, 1], [], []>} : vector<8x128xf32>, vector<128x128xf32>, vector<8x128xf32> -> vector<8x128xf32>
    %19 = arith.addf %17, %18 : vector<8x128xf32>
    %20 = math.tanh %19 : vector<8x128xf32>
    %c1_i32 = arith.constant 1 : i32
    %c8_i32_15 = arith.constant 8 : i32
    %21 = arith.muli %c1_i32, %c8_i32_15 : i32
    %c0_i32_16 = arith.constant 0 : i32
    %22 = arith.addi %21, %c0_i32_16 : i32
    %23 = tpu.assume_multiple %22, 8 : i32
    %24 = arith.index_cast %23 : i32 to index
    %c0_17 = arith.constant 0 : index
    %25 = vector.load %arg8[%24, %c0_17] : memref<64x128xf32, #tpu.memory_space<vmem>>, vector<8x128xf32>
    %cst_18 = arith.constant dense<0.000000e+00> : vector<8x128xf32>
    %26 = tpu.matmul %20, %1, %cst_18 {dimension_numbers = #tpu.dot_dimension_numbers<[1], [0], [0], [1], [0, 0, 1, 1], [], []>} : vector<8x128xf32>, vector<128x128xf32>, vector<8x128xf32> -> vector<8x128xf32>
    %27 = arith.addf %25, %26 : vector<8x128xf32>
    %28 = math.tanh %27 : vector<8x128xf32>
    %c2_i32 = arith.constant 2 : i32
    %c8_i32_19 = arith.constant 8 : i32
    %29 = arith.muli %c2_i32, %c8_i32_19 : i32
    %c0_i32_20 = arith.constant 0 : i32
    %30 = arith.addi %29, %c0_i32_20 : i32
    %31 = tpu.assume_multiple %30, 8 : i32
    %32 = arith.index_cast %31 : i32 to index
    %c0_21 = arith.constant 0 : index
    %33 = vector.load %arg8[%32, %c0_21] : memref<64x128xf32, #tpu.memory_space<vmem>>, vector<8x128xf32>
    %cst_22 = arith.constant dense<0.000000e+00> : vector<8x128xf32>
    %34 = tpu.matmul %28, %1, %cst_22 {dimension_numbers = #tpu.dot_dimension_numbers<[1], [0], [0], [1], [0, 0, 1, 1], [], []>} : vector<8x128xf32>, vector<128x128xf32>, vector<8x128xf32> -> vector<8x128xf32>
    %35 = arith.addf %33, %34 : vector<8x128xf32>
    %36 = math.tanh %35 : vector<8x128xf32>
    %c3_i32 = arith.constant 3 : i32
    %c8_i32_23 = arith.constant 8 : i32
    %37 = arith.muli %c3_i32, %c8_i32_23 : i32
    %c0_i32_24 = arith.constant 0 : i32
    %38 = arith.addi %37, %c0_i32_24 : i32
    %39 = tpu.assume_multiple %38, 8 : i32
    %40 = arith.index_cast %39 : i32 to index
    %c0_25 = arith.constant 0 : index
    %41 = vector.load %arg8[%40, %c0_25] : memref<64x128xf32, #tpu.memory_space<vmem>>, vector<8x128xf32>
    %cst_26 = arith.constant dense<0.000000e+00> : vector<8x128xf32>
    %42 = tpu.matmul %36, %1, %cst_26 {dimension_numbers = #tpu.dot_dimension_numbers<[1], [0], [0], [1], [0, 0, 1, 1], [], []>} : vector<8x128xf32>, vector<128x128xf32>, vector<8x128xf32> -> vector<8x128xf32>
    %43 = arith.addf %41, %42 : vector<8x128xf32>
    %44 = math.tanh %43 : vector<8x128xf32>
    %c4_i32 = arith.constant 4 : i32
    %c8_i32_27 = arith.constant 8 : i32
    %45 = arith.muli %c4_i32, %c8_i32_27 : i32
    %c0_i32_28 = arith.constant 0 : i32
    %46 = arith.addi %45, %c0_i32_28 : i32
    %47 = tpu.assume_multiple %46, 8 : i32
    %48 = arith.index_cast %47 : i32 to index
    %c0_29 = arith.constant 0 : index
    %49 = vector.load %arg8[%48, %c0_29] : memref<64x128xf32, #tpu.memory_space<vmem>>, vector<8x128xf32>
    %cst_30 = arith.constant dense<0.000000e+00> : vector<8x128xf32>
    %50 = tpu.matmul %44, %1, %cst_30 {dimension_numbers = #tpu.dot_dimension_numbers<[1], [0], [0], [1], [0, 0, 1, 1], [], []>} : vector<8x128xf32>, vector<128x128xf32>, vector<8x128xf32> -> vector<8x128xf32>
    %51 = arith.addf %49, %50 : vector<8x128xf32>
    %52 = math.tanh %51 : vector<8x128xf32>
    %c5_i32 = arith.constant 5 : i32
    %c8_i32_31 = arith.constant 8 : i32
    %53 = arith.muli %c5_i32, %c8_i32_31 : i32
    %c0_i32_32 = arith.constant 0 : i32
    %54 = arith.addi %53, %c0_i32_32 : i32
    %55 = tpu.assume_multiple %54, 8 : i32
    %56 = arith.index_cast %55 : i32 to index
    %c0_33 = arith.constant 0 : index
    %57 = vector.load %arg8[%56, %c0_33] : memref<64x128xf32, #tpu.memory_space<vmem>>, vector<8x128xf32>
    %cst_34 = arith.constant dense<0.000000e+00> : vector<8x128xf32>
    %58 = tpu.matmul %52, %1, %cst_34 {dimension_numbers = #tpu.dot_dimension_numbers<[1], [0], [0], [1], [0, 0, 1, 1], [], []>} : vector<8x128xf32>, vector<128x128xf32>, vector<8x128xf32> -> vector<8x128xf32>
    %59 = arith.addf %57, %58 : vector<8x128xf32>
    %60 = math.tanh %59 : vector<8x128xf32>
    %c6_i32 = arith.constant 6 : i32
    %c8_i32_35 = arith.constant 8 : i32
    %61 = arith.muli %c6_i32, %c8_i32_35 : i32
    %c0_i32_36 = arith.constant 0 : i32
    %62 = arith.addi %61, %c0_i32_36 : i32
    %63 = tpu.assume_multiple %62, 8 : i32
    %64 = arith.index_cast %63 : i32 to index
    %c0_37 = arith.constant 0 : index
    %65 = vector.load %arg8[%64, %c0_37] : memref<64x128xf32, #tpu.memory_space<vmem>>, vector<8x128xf32>
    %cst_38 = arith.constant dense<0.000000e+00> : vector<8x128xf32>
    %66 = tpu.matmul %60, %1, %cst_38 {dimension_numbers = #tpu.dot_dimension_numbers<[1], [0], [0], [1], [0, 0, 1, 1], [], []>} : vector<8x128xf32>, vector<128x128xf32>, vector<8x128xf32> -> vector<8x128xf32>
    %67 = arith.addf %65, %66 : vector<8x128xf32>
    %68 = math.tanh %67 : vector<8x128xf32>
    %c7_i32 = arith.constant 7 : i32
    %c8_i32_39 = arith.constant 8 : i32
    %69 = arith.muli %c7_i32, %c8_i32_39 : i32
    %c0_i32_40 = arith.constant 0 : i32
    %70 = arith.addi %69, %c0_i32_40 : i32
    %71 = tpu.assume_multiple %70, 8 : i32
    %72 = arith.index_cast %71 : i32 to index
    %c0_41 = arith.constant 0 : index
    %73 = vector.load %arg8[%72, %c0_41] : memref<64x128xf32, #tpu.memory_space<vmem>>, vector<8x128xf32>
    %cst_42 = arith.constant dense<0.000000e+00> : vector<8x128xf32>
    %74 = tpu.matmul %68, %1, %cst_42 {dimension_numbers = #tpu.dot_dimension_numbers<[1], [0], [0], [1], [0, 0, 1, 1], [], []>} : vector<8x128xf32>, vector<128x128xf32>, vector<8x128xf32> -> vector<8x128xf32>
    %75 = arith.addf %73, %74 : vector<8x128xf32>
    %76 = math.tanh %75 : vector<8x128xf32>
    %c8_i32_43 = arith.constant 8 : i32
    %c1_i32_44 = arith.constant 1 : i32
    %c0_45 = arith.constant 0 : index
    %c0_46 = arith.constant 0 : index
    %77 = vector.load %arg5[%c0_45, %c0_46] : memref<128x128xf32, #tpu.memory_space<vmem>>, vector<128x128xf32>
    %c0_47 = arith.constant 0 : index
    %c0_48 = arith.constant 0 : index
    %78 = vector.load %arg6[%c0_47, %c0_48] : memref<1x128xf32, #tpu.memory_space<vmem>>, vector<1x128xf32>
    %cst_49 = arith.constant dense<0.000000e+00> : vector<8x128xf32>
    %79 = tpu.matmul %76, %77, %cst_49 {dimension_numbers = #tpu.dot_dimension_numbers<[1], [0], [0], [1], [0, 0, 1, 1], [], []>} : vector<8x128xf32>, vector<128x128xf32>, vector<8x128xf32> -> vector<8x128xf32>
    %80 = vector.broadcast %78 : vector<1x128xf32> to vector<8x128xf32>
    %81 = arith.addf %79, %80 : vector<8x128xf32>
    %c0_50 = arith.constant 0 : index
    %c0_51 = arith.constant 0 : index
    %82 = vector.load %arg7[%c0_50, %c0_51] : memref<8x128xf32, #tpu.memory_space<vmem>>, vector<8x128xf32>
    tpu.vector_store %arg7[%c0_50, %c0_51], %81 {strides = array<i32>} : memref<8x128xf32, #tpu.memory_space<vmem>>, vector<8x128xf32>,
    return
  }
  func.func @transform_0(%arg0: i32) -> (i32, i32, i32) {
    %c0_i32 = arith.constant 0 : i32
    %c0_i32_0 = arith.constant 0 : i32
    %c0_i32_1 = arith.constant 0 : i32
    return %c0_i32, %arg0, %c0_i32_0 : i32, i32, i32
  }
  func.func @transform_1(%arg0: i32) -> (i32, i32) {
    %c0_i32 = arith.constant 0 : i32
    %c0_i32_0 = arith.constant 0 : i32
    %c0_i32_1 = arith.constant 0 : i32
    return %c0_i32, %c0_i32_0 : i32, i32
  }
  func.func @transform_2(%arg0: i32) -> (i32, i32) {
    %c0_i32 = arith.constant 0 : i32
    %c0_i32_0 = arith.constant 0 : i32
    %c0_i32_1 = arith.constant 0 : i32
    return %c0_i32, %c0_i32_0 : i32, i32
  }
  func.func @transform_3(%arg0: i32) -> (i32, i32) {
    %c0_i32 = arith.constant 0 : i32
    %c0_i32_0 = arith.constant 0 : i32
    %c0_i32_1 = arith.constant 0 : i32
    return %c0_i32, %c0_i32_0 : i32, i32
  }
  func.func @transform_4(%arg0: i32) -> (i32, i32) {
    %c0_i32 = arith.constant 0 : i32
    %c0_i32_0 = arith.constant 0 : i32
    %c0_i32_1 = arith.constant 0 : i32
    return %c0_i32, %c0_i32_0 : i32, i32
  }
  func.func @transform_5(%arg0: i32) -> (i32, i32) {
    %c0_i32 = arith.constant 0 : i32
    %c0_i32_0 = arith.constant 0 : i32
    %c0_i32_1 = arith.constant 0 : i32
    return %c0_i32, %c0_i32_0 : i32, i32
  }
  func.func @transform_6(%arg0: i32) -> (i32, i32) {
    %c0_i32 = arith.constant 0 : i32
    %c0_i32_0 = arith.constant 0 : i32
    return %arg0, %c0_i32 : i32, i32
  }
}

</mosaic_0001>

<bundles_post_ra>
// kernel: tpu_custom_call.1
= control target key start
LH: loop header
LB: loop body
LE: loop exit
PB: predicated region body
PF: predicated region fallthrough
CT: control target
= control target key end

     0   :  { %11 = vsyncpa [#allocation4], 0  ;;  %s2160_s0 = inlined_call_operand.hbm [shape: f32[8,8,16], index: 0, kind: input, shape index: {}]   ;;  %s2161_s1 = inlined_call_operand.hbm [shape: f32[16,128], index: 1, kind: input, shape index: {}]   ;;  %s2162_s2 = inlined_call_operand.hbm [shape: f32[128,128], index: 2, kind: input, shape index: {}]   ;;  %s2163_s3 = inlined_call_operand.vmem [shape: f32[1,128], index: 3, kind: input, shape index: {}]   ;;  %s2164_s4 = inlined_call_operand.hbm [shape: f32[128,128], index: 4, kind: input, shape index: {}]   ;;  %s2165_s5 = inlined_call_operand.vmem [shape: f32[1,128], index: 5, kind: input, shape index: {}]   ;;  %s2166_s6 = inlined_call_operand.hbm [shape: f32[8,128], index: 6, kind: output, shape index: {}]  }
   0x1   :  { %12 = vsyncpa [#allocation7], 0 }
   0x2   :  { %13 = vsyncpa [#allocation10], 0 }
   0x3   :  { %14 = vsyncpa [#allocation5], 0  ;;  %s1822_s21 = smov [#allocation6]   ;;  %s1823_s23 = smov [#allocation3]  }
   0x4   :  { %s32_s22 = sshll.u32 %s1822_s21, 4  ;;  %s20_s24 = sshll.u32 %s1823_s23, 4  ;;  %s33_s22 = int_to_ptr.vmem [resolvable:$true] %s32_s22  ;;  %s1867_s24 = int_to_ptr.vmem [resolvable:$true] %s20_s24 }
   0x5   :  { %s1704_s27 = scalar_lea.hbm %s2161_s1, 256 }
   0x6   :  { %p1705_p0 = scmp.ne.s32.totalorder %s2161_s1, %s1704_s27  ;;  %p1708_p1 = scmp.lt.u32.totalorder %s1704_s27, %s2161_s1 }
   0x8   :  { %p1710_p2 = pnand %p1708_p1, %p1705_p0 }
   0xa   :  { %1713 = shalt.err (!%p1710_p2)
}
   0xb   :  { %s1714_s8 = scalar_lea.vmem %s33_s22, 256  ;;  %p1719_p4 = scmp.lt.s32.totalorder %s33_s22, %s33_s22 }
   0xc   :  { %p1715_p3 = scmp.ne.s32.totalorder %s33_s22, %s1714_s8  ;;  %p1720_p5 = scmp.lt.s32.totalorder %s1714_s8, %s1714_s8 }
   0xe   :  { %p1721_p6 = por %p1720_p5, %p1719_p4 }
  0x10   :  { %p1722_p7 = pnand %p1721_p6, %p1715_p3 }
  0x12   :  { %1725 = shalt.err (!%p1722_p7)
}
  0x13   :  { %s1824_s9 = smov 128   ;;  %s1825_s10 = smov 8  }
  0x14   :  { %38 = dma.hbm_to_vmem [thread:$0]  %s2161_s1, 256, %s33_s22, [#allocation7], %s1824_s9, %s1824_s9, %s1825_s10  }
  0x15   :  { %s1726_s15 = scalar_lea.hbm %s2160_s0, 1024 }
  0x16   :  { %p1727_p8 = scmp.ne.s32.totalorder %s2160_s0, %s1726_s15  ;;  %p1730_p9 = scmp.lt.u32.totalorder %s1726_s15, %s2160_s0 }
  0x18   :  { %p1732_p10 = pnand %p1730_p9, %p1727_p8 }
  0x1a   :  { %1735 = shalt.err (!%p1732_p10)
}
  0x1b   :  { %s1736_s20 = scalar_lea.vmem %s1867_s24, 1024  ;;  %p1741_p12 = scmp.lt.s32.totalorder %s1867_s24, %s1867_s24 }
  0x1c   :  { %p1737_p11 = scmp.ne.s32.totalorder %s1867_s24, %s1736_s20  ;;  %p1742_p13 = scmp.lt.s32.totalorder %s1736_s20, %s1736_s20 }
  0x1e   :  { %p1743_p0 = por %p1742_p13, %p1741_p12 }
  0x20   :  { %p1744_p1 = pnand %p1743_p0, %p1737_p11 }
  0x22   :  { %1747 = shalt.err (!%p1744_p1)
}
  0x23   :  { %26 = dma.hbm_to_vmem [thread:$0]  %s2160_s0, 1024, %s1867_s24, [#allocation4], %s1824_s9, %s1824_s9, %s1825_s10  }
  0x24   :  { %s1826_s22 = smov [#allocation8]   ;;  %s1827_s25 = smov [#allocation9]  }
  0x25   :  { %s44_s23 = sshll.u32 %s1826_s22, 4  ;;  %s58_s26 = sshll.u32 %s1827_s25, 4  ;;  %s45_s23 = int_to_ptr.vmem [resolvable:$true] %s44_s23  ;;  %s1904_s26 = int_to_ptr.vmem [resolvable:$true] %s58_s26 }
  0x26   :  { %s1748_s29 = scalar_lea.hbm %s2162_s2, 2048 }
  0x27   :  { %p1749_p2 = scmp.ne.s32.totalorder %s2162_s2, %s1748_s29  ;;  %p1752_p3 = scmp.lt.u32.totalorder %s1748_s29, %s2162_s2 }
  0x29   :  { %p1754_p4 = pnand %p1752_p3, %p1749_p2 }
  0x2b   :  { %1757 = shalt.err (!%p1754_p4)
}
  0x2c   :  { %s1758_s0 = scalar_lea.vmem %s45_s23, 2048  ;;  %p1763_p6 = scmp.lt.s32.totalorder %s45_s23, %s45_s23 }
  0x2d   :  { %p1759_p5 = scmp.ne.s32.totalorder %s45_s23, %s1758_s0  ;;  %p1764_p7 = scmp.lt.s32.totalorder %s1758_s0, %s1758_s0 }
  0x2f   :  { %p1765_p8 = por %p1764_p7, %p1763_p6 }
  0x31   :  { %p1766_p9 = pnand %p1765_p8, %p1759_p5 }
  0x33   :  { %1769 = shalt.err (!%p1766_p9)
}
  0x34   :  { %50 = dma.hbm_to_vmem [thread:$0]  %s2162_s2, 2048, %s45_s23, [#allocation7], %s1824_s9, %s1824_s9, %s1825_s10  }
  0x35   :  { %s1770_s15 = scalar_lea.hbm %s2164_s4, 2048 }
  0x36   :  { %p1771_p10 = scmp.ne.s32.totalorder %s2164_s4, %s1770_s15  ;;  %p1774_p11 = scmp.lt.u32.totalorder %s1770_s15, %s2164_s4 }
  0x38   :  { %p1776_p12 = pnand %p1774_p11, %p1771_p10 }
  0x3a   :  { %1779 = shalt.err (!%p1776_p12)
}
  0x3b   :  { %s1780_s20 = scalar_lea.vmem %s1904_s26, 2048  ;;  %p1785_p0 = scmp.lt.s32.totalorder %s1904_s26, %s1904_s26 }
  0x3c   :  { %p1781_p13 = scmp.ne.s32.totalorder %s1904_s26, %s1780_s20  ;;  %p1786_p1 = scmp.lt.s32.totalorder %s1780_s20, %s1780_s20 }
  0x3e   :  { %p1787_p2 = por %p1786_p1, %p1785_p0 }
  0x40   :  { %p1788_p3 = pnand %p1787_p2, %p1781_p13 }
  0x42   :  { %1791 = shalt.err (!%p1788_p3)
}
  0x43   :  { %64 = dma.hbm_to_vmem [thread:$0]  %s2164_s4, 2048, %s1904_s26, [#allocation10], %s1824_s9, %s1824_s9, %s1825_s10  }
  0x44   :  { %1814 = dma.done.wait [#allocation4], 1024  }
  0x45   :  { %1815 = vsyncadd [#allocation4], 4294966272 }
  0x46   :  { %1816 = dma.done.wait [#allocation7], 2304  }
  0x47   :  { %1817 = vsyncadd [#allocation7], 4294964992 }
  0x48   :  { %1818 = dma.done.wait [#allocation10], 2048  }
  0x49   :  { %1819 = vsyncadd [#allocation10], 4294965248  ;;  %v1828_v0 = vmov 0.0|0.0   ;;  %vm1829_vm0 = vmmov 0   ;;  %v1830_v1 = vmov 0.0   ;;  %v81_v2 = vld [vmem:[#allocation8] sm:$0xff] }
  0x4a   :  { %1462 = vmatprep.subr.bf16.mxu1 %v1828_v0  ;;  %1175 = vmatprep.mubr.msk.f32.mxu1 %vm1829_vm0, %v1830_v1  ;;  %v82_v3 = vld [vmem:[#allocation8 + $0x8] sm:$0xff]  ;;  %v83_v4 = vld [vmem:[#allocation8 + $0x10] sm:$0xff]  ;;  %v84_v6 = vld [vmem:[#allocation8 + $0x18] sm:$0xff]  ;;  %vm114_vm1 = vcmask 130048   ;;  %s1831_s21 = smov [#allocation11]  }
  0x4b   :  { %v1944_v5 = vpack.c.bf16 %v82_v3, %v81_v2  ;;  %v1947_v7 = vpack.c.bf16 %v84_v6, %v83_v4  ;;  %v85_v8 = vld [vmem:[#allocation8 + $0x20] sm:$0xff]  ;;  %v86_v9 = vld [vmem:[#allocation8 + $0x28] sm:$0xff]  ;;  %v79_v10 = vld [vmem:[#allocation6] sm:$0xff]  ;;  %s943_s22 = sshll.u32 %s1831_s21, 4  ;;  %s944_s22 = int_to_ptr.vmem [resolvable:$true] %s943_s22 }
  0x4c   :  { %v80_v11 = vld [vmem:[#allocation6 + $0x8] sm:$0xff]  ;;  %v100_v13 = vld [vmem:[#allocation3] sm:$0xff]  ;;  %v1952_v14 = vpack.c.bf16 %v86_v9, %v85_v8  ;;  %v89_v19 = vld [vmem:[#allocation8 + $0x40] sm:$0xff]  ;;  %s1792_s23 = scalar_lea.vmem %s944_s22, 128  ;;  %p1797_p5 = scmp.lt.s32.totalorder %s944_s22, %s944_s22 }
  0x4d   :  { %1464 = vmatpush3.bf16.msra.mxu1 %v1944_v5  ;;  %v1458_v12 = vpack.c.bf16 %v80_v11, %v79_v10  ;;  %1131 = vmatprep.mubr.msk.f32.mxu0 %vm114_vm1, %v100_v13  ;;  %v87_v15 = vld [vmem:[#allocation8 + $0x30] sm:$0xff]  ;;  %v88_v16 = vld [vmem:[#allocation8 + $0x38] sm:$0xff]  ;;  %v90_v20 = vld [vmem:[#allocation8 + $0x48] sm:$0xff]  ;;  %p1793_p4 = scmp.ne.s32.totalorder %s944_s22, %s1792_s23  ;;  %p1798_p6 = scmp.lt.s32.totalorder %s1792_s23, %s1792_s23 }
  0x4e   :  { %1465 = vmatprep.subr.bf16.mxu1 %v1828_v0  ;;  %v101_v17 = vld [vmem:[#allocation3 + $0x8] sm:$0xff]  ;;  %v1957_v18 = vpack.c.bf16 %v88_v16, %v87_v15  ;;  %v1964_v21 = vpack.c.bf16 %v90_v20, %v89_v19  ;;  %v91_v22 = vld [vmem:[#allocation8 + $0x50] sm:$0xff]  ;;  %v93_v25 = vld [vmem:[#allocation8 + $0x60] sm:$0xff] }
  0x4f   :  { %1459 = vmatprep.subr.bf16.mxu0 %v1458_v12  ;;  %v92_v23 = vld [vmem:[#allocation8 + $0x58] sm:$0xff]  ;;  %v94_v26 = vld [vmem:[#allocation8 + $0x68] sm:$0xff]  ;;  %v95_v28 = vld [vmem:[#allocation8 + $0x70] sm:$0xff]  ;;  %p1799_p7 = por %p1798_p6, %p1797_p5 }
  0x50   :  { %1461 = vmatpush3.bf16.msra.mxu0 %v1458_v12  ;;  %v1970_v24 = vpack.c.bf16 %v92_v23, %v91_v22  ;;  %v1976_v27 = vpack.c.bf16 %v94_v26, %v93_v25  ;;  %v96_v29 = vld [vmem:[#allocation8 + $0x78] sm:$0xff]  ;;  %v102_v31 = vld [vmem:[#allocation3 + $0x10] sm:$0xff]  ;;  %v103_v32 = vld [vmem:[#allocation3 + $0x18] sm:$0xff] }
  0x51   :  { %1467 = vmatpush3.bf16.msra.mxu1 %v1947_v7  ;;  %1486 = vmatprep.subr.bf16.mxu0 %v1828_v0  ;;  %v1982_v30 = vpack.c.bf16 %v96_v29, %v95_v28  ;;  %v104_v33 = vld [vmem:[#allocation3 + $0x20] sm:$0xff]  ;;  %v105_v34 = vld [vmem:[#allocation3 + $0x28] sm:$0xff]  ;;  %v106_v35 = vld [vmem:[#allocation3 + $0x30] sm:$0xff]  ;;  %p1800_p8 = pnand %p1799_p7, %p1793_p4 }
  0x52   :  { %1468 = vmatprep.subr.bf16.mxu1 %v1828_v0  ;;  %v107_v36 = vld [vmem:[#allocation3 + $0x38] sm:$0xff]  ;;  %v2025_v39 = vld [vmem:[%s2163_s3] ss:$0 sm:$0xff]  ;;  %v847_v20 = vld [vmem:[#allocation9 + $0x20] sm:$0xff] }
  0x53   :  { %1132 = vmatmul.mubr.msk.f32.vlgmr.msra.gmra.mrb[0].mxu0 %vm114_vm1, %v101_v17  ;;  %v844_v15 = vld [vmem:[#allocation9 + $0x8] sm:$0xff]  ;;  %v845_v16 = vld [vmem:[#allocation9 + $0x10] sm:$0xff] }
  0x54   :  { %1488 = vmatpush3.bf16.msra.mxu0 %v1944_v5  ;;  %1134 = vmatprep.mubr.msk.f32.mxu0 %vm114_vm1, %v102_v31  ;;  %v849_v23 = vld [vmem:[#allocation9 + $0x30] sm:$0xff]  ;;  %v852_v26 = vld [vmem:[#allocation9 + $0x48] sm:$0xff] }
  0x55   :  { %1470 = vmatpush3.bf16.msra.mxu1 %v1952_v14  ;;  %1489 = vmatprep.subr.bf16.mxu0 %v1828_v0 }
  0x56   :  { %1471 = vmatprep.subr.bf16.mxu1 %v1828_v0 }
  0x57   :  { %1135 = vmatmul.mubr.msk.f32.gmra.mrb[2].mxu0 %vm114_vm1, %v103_v32 }
  0x58   :  { %1491 = vmatpush3.bf16.msra.mxu0 %v1947_v7  ;;  %1137 = vmatprep.mubr.msk.f32.mxu0 %vm114_vm1, %v104_v33  ;;  %v853_v33 = vld [vmem:[#allocation9 + $0x50] sm:$0xff] }
  0x59   :  { %1473 = vmatpush3.bf16.msra.mxu1 %v1957_v18  ;;  %1492 = vmatprep.subr.bf16.mxu0 %v1828_v0 }
  0x5a   :  { %1474 = vmatprep.subr.bf16.mxu1 %v1828_v0 }
  0x5b   :  { %1138 = vmatmul.mubr.msk.f32.gmra.mrb[4].mxu0 %vm114_vm1, %v105_v34  ;;  %v854_v34 = vld [vmem:[#allocation9 + $0x58] sm:$0xff] }
  0x5c   :  { %1494 = vmatpush3.bf16.msra.mxu0 %v1952_v14  ;;  %1140 = vmatprep.mubr.msk.f32.mxu0 %vm114_vm1, %v106_v35  ;;  %v1670_v35 = vpack.c.bf16 %v854_v34, %v853_v33 }
  0x5d   :  { %1476 = vmatpush3.bf16.msra.mxu1 %v1964_v21  ;;  %1495 = vmatprep.subr.bf16.mxu0 %v1828_v0 }
  0x5e   :  { %1477 = vmatprep.subr.bf16.mxu1 %v1828_v0 }
  0x5f   :  { %1141 = vmatmul.mubr.msk.f32.gmra.mrb[6].mxu0 %vm114_vm1, %v107_v36  ;;  %v855_v36 = vld [vmem:[#allocation9 + $0x60] sm:$0xff] }
  0x60   :  { %1497 = vmatpush3.bf16.msra.mxu0 %v1957_v18  ;;  %1210 = vmatprep.mubr.msk.f32.mxu0 %vm1829_vm0, %v1830_v1 }
  0x61   :  { %1479 = vmatpush3.bf16.msra.mxu1 %v1970_v24  ;;  %1498 = vmatprep.subr.bf16.mxu0 %v1828_v0 }
  0x62   :  { %1480 = vmatprep.subr.bf16.mxu1 %v1828_v0 }
  0x64   :  { %1500 = vmatpush3.bf16.msra.mxu0 %v1964_v21 }
  0x65   :  { %1482 = vmatpush3.bf16.msra.mxu1 %v1976_v27  ;;  %1501 = vmatprep.subr.bf16.mxu0 %v1828_v0 }
  0x66   :  { %1483 = vmatprep.subr.bf16.mxu1 %v1828_v0 }
  0x68   :  { %1503 = vmatpush3.bf16.msra.mxu0 %v1970_v24 }
  0x69   :  { %1485 = vmatpush3.bf16.msra.mxu1 %v1982_v30  ;;  %1504 = vmatprep.subr.bf16.mxu0 %v1828_v0 }
  0x6a   :  { %1510 = vmatprep.subr.bf16.mxu1 %v1828_v0 }
  0x6c   :  { %1176 = vmatmul.mubr.f32.vlgmr.msra.gmra.mrb[0].mxu1 %v1830_v1  ;;  %1506 = vmatpush3.bf16.msra.mxu0 %v1976_v27 }
  0x6d   :  { %1512 = vmatpush3.bf16.msra.mxu1 %v1944_v5  ;;  %1245 = vmatprep.mubr.msk.f32.mxu1 %vm1829_vm0, %v1830_v1 }
  0x6e   :  { %1513 = vmatprep.subr.bf16.mxu1 %v1828_v0  ;;  %1507 = vmatprep.subr.bf16.mxu0 %v1828_v0 }
  0x70   :  { %1509 = vmatpush3.bf16.msra.mxu0 %v1982_v30 }
  0x71   :  { %1515 = vmatpush3.bf16.msra.mxu1 %v1947_v7  ;;  %1534 = vmatprep.subr.bf16.mxu0 %v1828_v0 }
  0x72   :  { %1516 = vmatprep.subr.bf16.mxu1 %v1828_v0 }
  0x75   :  { %1518 = vmatpush3.bf16.msra.mxu1 %v1952_v14 }
  0x76   :  { %1519 = vmatprep.subr.bf16.mxu1 %v1828_v0 }
  0x79   :  { %1521 = vmatpush3.bf16.msra.mxu1 %v1957_v18 }
  0x7a   :  { %1522 = vmatprep.subr.bf16.mxu1 %v1828_v0 }
  0x7d   :  { %1524 = vmatpush3.bf16.msra.mxu1 %v1964_v21 }
  0x7e   :  { %1525 = vmatprep.subr.bf16.mxu1 %v1828_v0 }
  0x81   :  { %1527 = vmatpush3.bf16.msra.mxu1 %v1970_v24 }
  0x82   :  { %1528 = vmatprep.subr.bf16.mxu1 %v1828_v0 }
  0x85   :  { %1530 = vmatpush3.bf16.msra.mxu1 %v1976_v27 }
  0x86   :  { %1531 = vmatprep.subr.bf16.mxu1 %v1828_v0 }
  0x89   :  { %1533 = vmatpush3.bf16.msra.mxu1 %v1982_v30 }
  0x8a   :  { %1558 = vmatprep.subr.bf16.mxu1 %v1828_v0 }
 0x126   :  { %v1133_v37 = vpop.f32.mrb[0].mxu0 }
 0x127   :  { %v205_v38 = vpop.f32.mrb[1].mxu0  ;;  %v211_v51 = vadd.f32 %v1133_v37, %v2025_v39  ;;  %v856_v37 = vld [vmem:[#allocation9 + $0x68] sm:$0xff] }
 0x128   :  { %v206_v40 = vadd.f32 %v2025_v39, %v205_v38  ;;  %v1673_v38 = vpack.c.bf16 %v856_v37, %v855_v36 }
 0x12a   :  { %v1136_v45 = vpop.f32.mrb[2].mxu0 }
 0x12b   :  { %v215_v46 = vpop.f32.mrb[3].mxu0  ;;  %v221_v61 = vadd.f32 %v1136_v45, %v2025_v39 }
 0x12c   :  { %v216_v56 = vadd.f32 %v2025_v39, %v215_v46 }
 0x12e   :  { %v2046_v47 = vpop.f32.mrb[4].mxu0 }
 0x12f   :  { %v2048_v48 = vpop.f32.mrb[5].mxu0 }
 0x130   :  { %v226_v4 = vadd.f32 %v2025_v39, %v2048_v48  ;;  %v963_v48 = vld [vmem:[%s2165_s5] ss:$0 sm:$0xff] }
 0x132   :  { %v2050_v49 = vpop.f32.mrb[6].mxu0 }
 0x133   :  { %v2052_v50 = vpop.f32.mrb[7].mxu0 }
 0x134   :  { %v236_v28 = vadd.f32 %v2025_v39, %v2052_v50 }
 0x13f   :  { %v319_v41 = vpop.f32.mrb[0].mxu1 }
 0x140   :  { %v323_v42 = vadd.f32 %v319_v41, %v206_v40  ;;  %v1177_v43 = vpop.f32.mrb[1].mxu1  ;;  %v857_v40 = vld [vmem:[#allocation9 + $0x70] sm:$0xff]  ;;  %v858_v41 = vld [vmem:[#allocation9 + $0x78] sm:$0xff] }
 0x141   :  { %v241_v43 = vadd.f32 %v2050_v49, %v2025_v39 }
 0x142   :  { %1688 = vtanh.f32 %v323_v42  ;;  %v1676_v42 = vpack.c.bf16 %v858_v41, %v857_v40 }
 0x14c   :  { %v1689_v44 = vpop.eup %1688 }
 0x14d   :  { %1211 = vmatmul.mubr.f32.vlgmr.msra.gmra.mrb[8].mxu0 %v1689_v44 }
 0x14e   :  { %1536 = vmatpush3.bf16.msra.mxu0 %v1944_v5  ;;  %1280 = vmatprep.mubr.msk.f32.mxu0 %vm1829_vm0, %v1830_v1 }
 0x14f   :  { %1537 = vmatprep.subr.bf16.mxu0 %v1828_v0 }
 0x152   :  { %1539 = vmatpush3.bf16.msra.mxu0 %v1947_v7 }
 0x153   :  { %1540 = vmatprep.subr.bf16.mxu0 %v1828_v0 }
 0x156   :  { %1542 = vmatpush3.bf16.msra.mxu0 %v1952_v14 }
 0x157   :  { %1543 = vmatprep.subr.bf16.mxu0 %v1828_v0 }
 0x15a   :  { %1545 = vmatpush3.bf16.msra.mxu0 %v1957_v18 }
 0x15b   :  { %1546 = vmatprep.subr.bf16.mxu0 %v1828_v0 }
 0x15e   :  { %1548 = vmatpush3.bf16.msra.mxu0 %v1964_v21 }
 0x15f   :  { %1549 = vmatprep.subr.bf16.mxu0 %v1828_v0 }
 0x162   :  { %1551 = vmatpush3.bf16.msra.mxu0 %v1970_v24 }
 0x163   :  { %1552 = vmatprep.subr.bf16.mxu0 %v1828_v0 }
 0x166   :  { %1554 = vmatpush3.bf16.msra.mxu0 %v1976_v27 }
 0x167   :  { %1555 = vmatprep.subr.bf16.mxu0 %v1828_v0 }
 0x16a   :  { %1557 = vmatpush3.bf16.msra.mxu0 %v1982_v30 }
 0x16b   :  { %1582 = vmatprep.subr.bf16.mxu0 %v1828_v0 }
 0x220   :  { %v393_v52 = vpop.f32.mrb[8].mxu0 }
 0x221   :  { %v397_v53 = vadd.f32 %v393_v52, %v211_v51  ;;  %v1212_v54 = vpop.f32.mrb[9].mxu0 }
 0x223   :  { %1690 = vtanh.f32 %v397_v53 }
 0x22d   :  { %v1691_v55 = vpop.eup %1690 }
 0x22e   :  { %1246 = vmatmul.mubr.f32.vlgmr.msra.gmra.mrb[2].mxu1 %v1691_v55 }
 0x22f   :  { %1560 = vmatpush3.bf16.msra.mxu1 %v1944_v5  ;;  %1315 = vmatprep.mubr.msk.f32.mxu1 %vm1829_vm0, %v1830_v1 }
 0x230   :  { %1561 = vmatprep.subr.bf16.mxu1 %v1828_v0 }
 0x233   :  { %1563 = vmatpush3.bf16.msra.mxu1 %v1947_v7 }
 0x234   :  { %1564 = vmatprep.subr.bf16.mxu1 %v1828_v0 }
 0x237   :  { %1566 = vmatpush3.bf16.msra.mxu1 %v1952_v14 }
 0x238   :  { %1567 = vmatprep.subr.bf16.mxu1 %v1828_v0 }
 0x23b   :  { %1569 = vmatpush3.bf16.msra.mxu1 %v1957_v18 }
 0x23c   :  { %1570 = vmatprep.subr.bf16.mxu1 %v1828_v0 }
 0x23f   :  { %1572 = vmatpush3.bf16.msra.mxu1 %v1964_v21 }
 0x240   :  { %1573 = vmatprep.subr.bf16.mxu1 %v1828_v0 }
 0x243   :  { %1575 = vmatpush3.bf16.msra.mxu1 %v1970_v24 }
 0x244   :  { %1576 = vmatprep.subr.bf16.mxu1 %v1828_v0 }
 0x247   :  { %1578 = vmatpush3.bf16.msra.mxu1 %v1976_v27 }
 0x248   :  { %1579 = vmatprep.subr.bf16.mxu1 %v1828_v0 }
 0x24b   :  { %1581 = vmatpush3.bf16.msra.mxu1 %v1982_v30 }
 0x24c   :  { %1606 = vmatprep.subr.bf16.mxu1 %v1828_v0 }
 0x301   :  { %v467_v57 = vpop.f32.mrb[2].mxu1 }
 0x302   :  { %v471_v58 = vadd.f32 %v467_v57, %v216_v56  ;;  %v1247_v59 = vpop.f32.mrb[3].mxu1 }
 0x304   :  { %1692 = vtanh.f32 %v471_v58 }
 0x30e   :  { %v1693_v60 = vpop.eup %1692 }
 0x30f   :  { %1281 = vmatmul.mubr.f32.vlgmr.msra.gmra.mrb[10].mxu0 %v1693_v60 }
 0x310   :  { %1584 = vmatpush3.bf16.msra.mxu0 %v1944_v5  ;;  %1350 = vmatprep.mubr.msk.f32.mxu0 %vm1829_vm0, %v1830_v1 }
 0x311   :  { %1585 = vmatprep.subr.bf16.mxu0 %v1828_v0 }
 0x314   :  { %1587 = vmatpush3.bf16.msra.mxu0 %v1947_v7 }
 0x315   :  { %1588 = vmatprep.subr.bf16.mxu0 %v1828_v0 }
 0x318   :  { %1590 = vmatpush3.bf16.msra.mxu0 %v1952_v14 }
 0x319   :  { %1591 = vmatprep.subr.bf16.mxu0 %v1828_v0 }
 0x31c   :  { %1593 = vmatpush3.bf16.msra.mxu0 %v1957_v18 }
 0x31d   :  { %1594 = vmatprep.subr.bf16.mxu0 %v1828_v0 }
 0x320   :  { %1596 = vmatpush3.bf16.msra.mxu0 %v1964_v21 }
 0x321   :  { %1597 = vmatprep.subr.bf16.mxu0 %v1828_v0 }
 0x324   :  { %1599 = vmatpush3.bf16.msra.mxu0 %v1970_v24 }
 0x325   :  { %1600 = vmatprep.subr.bf16.mxu0 %v1828_v0 }
 0x328   :  { %1602 = vmatpush3.bf16.msra.mxu0 %v1976_v27 }
 0x329   :  { %1603 = vmatprep.subr.bf16.mxu0 %v1828_v0 }
 0x32c   :  { %1605 = vmatpush3.bf16.msra.mxu0 %v1982_v30 }
 0x32d   :  { %1630 = vmatprep.subr.bf16.mxu0 %v1828_v0 }
 0x3e2   :  { %v541_v62 = vpop.f32.mrb[10].mxu0 }
 0x3e3   :  { %v545_v63 = vadd.f32 %v541_v62, %v221_v61  ;;  %v1282_v2 = vpop.f32.mrb[11].mxu0 }
 0x3e5   :  { %1694 = vtanh.f32 %v545_v63 }
 0x3ef   :  { %v1695_v3 = vpop.eup %1694 }
 0x3f0   :  { %1316 = vmatmul.mubr.f32.vlgmr.msra.gmra.mrb[4].mxu1 %v1695_v3 }
 0x3f1   :  { %1608 = vmatpush3.bf16.msra.mxu1 %v1944_v5  ;;  %1385 = vmatprep.mubr.msk.f32.mxu1 %vm1829_vm0, %v1830_v1 }
 0x3f2   :  { %1609 = vmatprep.subr.bf16.mxu1 %v1828_v0 }
 0x3f5   :  { %1611 = vmatpush3.bf16.msra.mxu1 %v1947_v7 }
 0x3f6   :  { %1612 = vmatprep.subr.bf16.mxu1 %v1828_v0 }
 0x3f9   :  { %1614 = vmatpush3.bf16.msra.mxu1 %v1952_v14 }
 0x3fa   :  { %1615 = vmatprep.subr.bf16.mxu1 %v1828_v0 }
 0x3fd   :  { %1617 = vmatpush3.bf16.msra.mxu1 %v1957_v18 }
 0x3fe   :  { %1618 = vmatprep.subr.bf16.mxu1 %v1828_v0 }
 0x401   :  { %1620 = vmatpush3.bf16.msra.mxu1 %v1964_v21 }
 0x402   :  { %1621 = vmatprep.subr.bf16.mxu1 %v1828_v0 }
 0x405   :  { %1623 = vmatpush3.bf16.msra.mxu1 %v1970_v24 }
 0x406   :  { %1624 = vmatprep.subr.bf16.mxu1 %v1828_v0 }
 0x409   :  { %1626 = vmatpush3.bf16.msra.mxu1 %v1976_v27 }
 0x40a   :  { %1627 = vmatprep.subr.bf16.mxu1 %v1828_v0 }
 0x40d   :  { %1629 = vmatpush3.bf16.msra.mxu1 %v1982_v30 }
 0x40e   :  { %1654 = vmatprep.subr.bf16.mxu1 %v1828_v0 }
 0x4c3   :  { %v615_v6 = vpop.f32.mrb[4].mxu1 }
 0x4c4   :  { %v619_v8 = vadd.f32 %v615_v6, %v226_v4  ;;  %v1317_v9 = vpop.f32.mrb[5].mxu1 }
 0x4c6   :  { %1696 = vtanh.f32 %v619_v8 }
 0x4d0   :  { %v1697_v10 = vpop.eup %1696 }
 0x4d1   :  { %1351 = vmatmul.mubr.f32.vlgmr.msra.gmra.mrb[12].mxu0 %v1697_v10 }
 0x4d2   :  { %1632 = vmatpush3.bf16.msra.mxu0 %v1944_v5  ;;  %1420 = vmatprep.mubr.msk.f32.mxu0 %vm1829_vm0, %v1830_v1  ;;  %v231_v5 = vadd.f32 %v2046_v47, %v2025_v39 }
 0x4d3   :  { %1633 = vmatprep.subr.bf16.mxu0 %v1828_v0 }
 0x4d6   :  { %1635 = vmatpush3.bf16.msra.mxu0 %v1947_v7 }
 0x4d7   :  { %1636 = vmatprep.subr.bf16.mxu0 %v1828_v0 }
 0x4da   :  { %1638 = vmatpush3.bf16.msra.mxu0 %v1952_v14  ;;  %v843_v14 = vld [vmem:[#allocation9] sm:$0xff] }
 0x4db   :  { %1639 = vmatprep.subr.bf16.mxu0 %v1828_v0  ;;  %v1655_v17 = vpack.c.bf16 %v844_v15, %v843_v14 }
 0x4de   :  { %1641 = vmatpush3.bf16.msra.mxu0 %v1957_v18  ;;  %v846_v18 = vld [vmem:[#allocation9 + $0x18] sm:$0xff] }
 0x4df   :  { %1642 = vmatprep.subr.bf16.mxu0 %v1828_v0  ;;  %v1658_v19 = vpack.c.bf16 %v846_v18, %v845_v16 }
 0x4e2   :  { %1644 = vmatpush3.bf16.msra.mxu0 %v1964_v21  ;;  %v848_v21 = vld [vmem:[#allocation9 + $0x28] sm:$0xff] }
 0x4e3   :  { %1645 = vmatprep.subr.bf16.mxu0 %v1828_v0  ;;  %v1661_v22 = vpack.c.bf16 %v848_v21, %v847_v20 }
 0x4e6   :  { %1647 = vmatpush3.bf16.msra.mxu0 %v1970_v24  ;;  %v850_v24 = vld [vmem:[#allocation9 + $0x38] sm:$0xff] }
 0x4e7   :  { %1648 = vmatprep.subr.bf16.mxu0 %v1828_v0  ;;  %v1664_v25 = vpack.c.bf16 %v850_v24, %v849_v23 }
 0x4ea   :  { %1650 = vmatpush3.bf16.msra.mxu0 %v1976_v27 }
 0x4eb   :  { %1651 = vmatprep.subr.bf16.mxu0 %v1828_v0 }
 0x4ee   :  { %1653 = vmatpush3.bf16.msra.mxu0 %v1982_v30 }
 0x5a4   :  { %v689_v7 = vpop.f32.mrb[12].mxu0 }
 0x5a5   :  { %v693_v11 = vadd.f32 %v689_v7, %v231_v5  ;;  %v1352_v12 = vpop.f32.mrb[13].mxu0 }
 0x5a7   :  { %1698 = vtanh.f32 %v693_v11 }
 0x5b1   :  { %v1699_v13 = vpop.eup %1698 }
 0x5b2   :  { %1386 = vmatmul.mubr.f32.vlgmr.msra.gmra.mrb[6].mxu1 %v1699_v13 }
 0x5b3   :  { %1455 = vmatprep.mubr.msk.f32.mxu1 %vm1829_vm0, %v1830_v1  ;;  %1656 = vmatpush3.bf16.msra.mxu1 %v1655_v17  ;;  %v851_v1 = vld [vmem:[#allocation9 + $0x40] sm:$0xff] }
 0x5b4   :  { %1657 = vmatprep.subr.bf16.mxu1 %v1828_v0  ;;  %v1667_v27 = vpack.c.bf16 %v852_v26, %v851_v1 }
 0x5b7   :  { %1659 = vmatpush3.bf16.msra.mxu1 %v1658_v19 }
 0x5b8   :  { %1660 = vmatprep.subr.bf16.mxu1 %v1828_v0 }
 0x5bb   :  { %1662 = vmatpush3.bf16.msra.mxu1 %v1661_v22 }
 0x5bc   :  { %1663 = vmatprep.subr.bf16.mxu1 %v1828_v0 }
 0x5bf   :  { %1665 = vmatpush3.bf16.msra.mxu1 %v1664_v25 }
 0x5c0   :  { %1666 = vmatprep.subr.bf16.mxu1 %v1828_v0 }
 0x5c3   :  { %1668 = vmatpush3.bf16.msra.mxu1 %v1667_v27 }
 0x5c4   :  { %1669 = vmatprep.subr.bf16.mxu1 %v1828_v0 }
 0x5c7   :  { %1671 = vmatpush3.bf16.msra.mxu1 %v1670_v35 }
 0x5c8   :  { %1672 = vmatprep.subr.bf16.mxu1 %v1828_v0 }
 0x5cb   :  { %1674 = vmatpush3.bf16.msra.mxu1 %v1673_v38 }
 0x5cc   :  { %1675 = vmatprep.subr.bf16.mxu1 %v1828_v0 }
 0x5cf   :  { %1677 = vmatpush3.bf16.msra.mxu1 %v1676_v42 }
 0x685   :  { %v763_v29 = vpop.f32.mrb[6].mxu1 }
 0x686   :  { %v767_v30 = vadd.f32 %v763_v29, %v236_v28  ;;  %v1387_v31 = vpop.f32.mrb[7].mxu1 }
 0x688   :  { %1700 = vtanh.f32 %v767_v30 }
 0x692   :  { %v1701_v32 = vpop.eup %1700 }
 0x693   :  { %1421 = vmatmul.mubr.f32.vlgmr.msra.gmra.mrb[14].mxu0 %v1701_v32 }
 0x766   :  { %v837_v44 = vpop.f32.mrb[14].mxu0 }
 0x767   :  { %v841_v45 = vadd.f32 %v837_v44, %v241_v43  ;;  %v1422_v46 = vpop.f32.mrb[15].mxu0 }
 0x769   :  { %1702 = vtanh.f32 %v841_v45 }
 0x773   :  { %v1703_v47 = vpop.eup %1702 }
 0x774   :  { %1456 = vmatmul.mubr.f32.vlgmr.msra.gmra.mrb[8].mxu1 %v1703_v47 }
 0x847   :  { %v932_v50 = vpop.f32.mrb[8].mxu1 }
 0x848   :  { %v933_v51 = vadd.f32 %v963_v48, %v932_v50  ;;  %v1457_v52 = vpop.f32.mrb[9].mxu1 }
 0x84a   :  { %936 = vst [vmem:[#allocation11] sm:$0xff] %v933_v51 }
 0x84b   :  { %1803 = shalt.err (!%p1800_p8)
}
 0x84c   :  { %s1804_s27 = scalar_lea.hbm %s2166_s6, 128 }
 0x84d   :  { %p1805_p9 = scmp.ne.s32.totalorder %s2166_s6, %s1804_s27  ;;  %p1808_p10 = scmp.lt.u32.totalorder %s1804_s27, %s2166_s6 }
 0x84f   :  { %p1810_p11 = pnand %p1808_p10, %p1805_p9 }
 0x851   :  { %1813 = shalt.err (!%p1810_p11)
}
 0x852   :  { %946 = dma.vmem_to_hbm [thread:$0]  %s944_s22, 128, %s2166_s6, [#allocation5]  }
 0x853   :  { %1820 = dma.done.wait [#allocation5], 128  }
 0x854   :  { %1821 = vsyncadd [#allocation5], 4294967168 }
 0x855   :  { %950 = vsyncpa [#allocation4], 1 }
 0x856   :  { %951 = vsyncpa [#allocation7], 1 }
 0x857   :  { %952 = vsyncpa [#allocation10], 1 }
 0x858   :  { %953 = vsyncpa [#allocation5], 1 }

</bundles_post_ra>
